<compile_context>
chip_gen: v5e
topology: v5e:2x2
jax: 0.10.0
libtpu: 0.0.40
codegen_flags: <defaults>
</compile_context>

<pallas_src>
import functools

import jax
import jax.numpy as jnp
from jax import lax
from jax.experimental import pallas as pl
from jax.experimental.pallas import tpu as pltpu

ALPHA = 1.0
GAMMA = 2.0          # exploited below: (1 - pt) ** 2 is an explicit square
LOG_CLAMP = -100.0   # PyTorch binary_cross_entropy clamps log terms at -100
LANES = 128


def _focal_loss_kernel(x_ref, t_ref, o_ref, acc_ref, *,
                       row_tile, tiles_per_core, total_elems):
    c = pl.program_id(0)          # core split (parallel)
    i = pl.program_id(1)          # tile loop (arbitrary / reduction)

    @pl.when(i == 0)
    def _():
        acc_ref[...] = jnp.zeros_like(acc_ref)

    p = x_ref[...].astype(jnp.float32)
    t = t_ref[...].astype(jnp.float32)

    # binary_cross_entropy(reduction='none') with PyTorch's log clamping
    log_p = jnp.maximum(jnp.log(p), LOG_CLAMP)
    log_1mp = jnp.maximum(jnp.log(1.0 - p), LOG_CLAMP)
    bce = -(t * log_p + (1.0 - t) * log_1mp)

    # pt = exp(-bce); focal = alpha * (1 - pt)^2 * bce  (gamma == 2 -> explicit square)
    pt = jnp.exp(-bce)
    one_minus_pt = 1.0 - pt
    focal = ALPHA * (one_minus_pt * one_minus_pt) * bce

    # Mask ragged tail / out-of-bounds rows of partial or clamped tiles.
    tile_global = c * tiles_per_core + i
    row = lax.broadcasted_iota(jnp.int32, (row_tile, LANES), 0)
    lane = lax.broadcasted_iota(jnp.int32, (row_tile, LANES), 1)
    elem = (tile_global * row_tile + row) * LANES + lane
    focal = jnp.where(elem < total_elems, focal, 0.0)

    # Vector accumulation: (row_tile,128) -> (8,128) via cross-vreg VPU adds only.
    acc_ref[...] += focal.reshape(row_tile // 8, 8, LANES).sum(axis=0)

    @pl.when(i == pl.num_programs(1) - 1)
    def _():
        o_ref[...] = acc_ref[...]


def focal_loss(inputs, targets, *, row_tile=2048, n_split=2):
    """inputs/targets: any shape (probabilities / labels). Returns scalar mean focal loss."""
    assert inputs.shape == targets.shape
    total = inputs.size

    # Flatten (free); keep native dtype (cast happens in-kernel on the loaded tile).
    flat_x = inputs.reshape(-1)
    flat_t = targets.reshape(-1)

    # Only pad up to a multiple of one (8,128) vreg so the 2D reshape is legal;
    # correctness of the tail is handled by the in-kernel element mask.
    pad = (-total) % (8 * LANES)
    if pad:
        flat_x = jnp.pad(flat_x, (0, pad))
        flat_t = jnp.pad(flat_t, (0, pad))

    rows = flat_x.size // LANES
    x2 = flat_x.reshape(rows, LANES)
    t2 = flat_t.reshape(rows, LANES)

    # Tile rows: big (default 2048 -> 1 MiB f32 per block per input, double-buffered
    # => ~4 MiB VMEM, comfortably inside scoped VMEM on v5e/v6e/v7x), multiple of 8,
    # clamped to the array extent.
    rt = max(8, (min(row_tile, rows) // 8) * 8)
    num_tiles = pl.cdiv(rows, rt)
    tiles_per_core = pl.cdiv(num_tiles, n_split)
    max_tile = num_tiles - 1

    def in_map(c, i):
        # Clamp so the block index is always valid; fully-redundant (clamped) tiles are
        # zeroed by the in-kernel element mask.
        return (jnp.minimum(c * tiles_per_core + i, max_tile), 0)

    kernel = functools.partial(
        _focal_loss_kernel,
        row_tile=rt,
        tiles_per_core=tiles_per_core,
        total_elems=total,
    )

    partials = pl.pallas_call(
        kernel,
        out_shape=jax.ShapeDtypeStruct((n_split * 8, LANES), jnp.float32),
        grid_spec=pltpu.PrefetchScalarGridSpec(
            num_scalar_prefetch=0,
            grid=(n_split, tiles_per_core),
            in_specs=[
                pl.BlockSpec((rt, LANES), in_map),
                pl.BlockSpec((rt, LANES), in_map),
            ],
            out_specs=pl.BlockSpec((8, LANES), lambda c, i: (c, 0)),
            scratch_shapes=[pltpu.VMEM((8, LANES), jnp.float32)],
        ),
        compiler_params=pltpu.CompilerParams(
            dimension_semantics=("parallel", "arbitrary"),
        ),
    )(x2, t2)

    # Tiny epilogue: single cross-lane reduce of the per-core (8,128) partials + mean.
    return partials.sum() / jnp.float32(total)


if __name__ == "__main__":
    key = jax.random.PRNGKey(0)
    k1, k2 = jax.random.split(key)
    shape = (2, 4, 16, 16)
    # inputs are probabilities in (0, 1); targets are binary labels (BCE also accepts soft)
    inputs = jax.random.uniform(k1, shape, jnp.float32, minval=1e-4, maxval=1.0 - 1e-4)
    targets = (jax.random.uniform(k2, shape, jnp.float32) > 0.5).astype(jnp.float32)

    loss = focal_loss(inputs, targets)
    loss = jax.block_until_ready(loss)

    # pure-JAX reference check
    log_p = jnp.maximum(jnp.log(inputs), LOG_CLAMP)
    log_1mp = jnp.maximum(jnp.log(1.0 - inputs), LOG_CLAMP)
    bce = -(targets * log_p + (1.0 - targets) * log_1mp)
    pt = jnp.exp(-bce)
    ref = jnp.mean(ALPHA * (1.0 - pt) ** GAMMA * bce)
    assert jnp.allclose(loss, ref, rtol=1e-5, atol=1e-6), (loss, ref)

    print("KERNEL_OK")
</pallas_src>

<mosaic_0001>
module attributes {stable_mosaic.version = 11 : i64} {
  func.func @_focal_loss_kernel(%arg0: i32, %arg1: i32, %arg2: memref<16x128xf32, #tpu.memory_space<vmem>>, %arg3: memref<16x128xf32, #tpu.memory_space<vmem>>, %arg4: memref<8x128xf32, #tpu.memory_space<vmem>>, %arg5: memref<8x128xf32, #tpu.memory_space<vmem>>) attributes {dimension_semantics = [#tpu.dimension_semantics<parallel>, #tpu.dimension_semantics<arbitrary>], iteration_bounds = array<i64: 2, 1>, scalar_prefetch = 0 : i64, scratch_operands = 1 : i64, tpu.core_type = #tpu.core_type<tc>, window_params = [{transform_indices = @transform_0, window_bounds = array<i64: 16, 128>}, {transform_indices = @transform_1, window_bounds = array<i64: 16, 128>}, {transform_indices = @transform_2, window_bounds = array<i64: 8, 128>}]} {
    %c0_i32 = arith.constant 0 : i32
    %0 = arith.cmpi eq, %arg1, %c0_i32 : i32
    %1 = arith.extui %0 : i1 to i32
    %c0_i32_0 = arith.constant 0 : i32
    %2 = arith.cmpi ne, %1, %c0_i32_0 : i32
    scf.if %2 {
      %cst_19 = arith.constant 0.000000e+00 : f32
      %51 = vector.broadcast %cst_19 : f32 to vector<8x128xf32>
      %c0_20 = arith.constant 0 : index
      %c0_21 = arith.constant 0 : index
      %52 = vector.load %arg5[%c0_20, %c0_21] : memref<8x128xf32, #tpu.memory_space<vmem>>, vector<8x128xf32>
      tpu.vector_store %arg5[%c0_20, %c0_21], %51 {strides = array<i32>} : memref<8x128xf32, #tpu.memory_space<vmem>>, vector<8x128xf32>,
    } else {
    }
    %c0 = arith.constant 0 : index
    %c0_1 = arith.constant 0 : index
    %3 = vector.load %arg2[%c0, %c0_1] : memref<16x128xf32, #tpu.memory_space<vmem>>, vector<16x128xf32>
    %c0_2 = arith.constant 0 : index
    %c0_3 = arith.constant 0 : index
    %4 = vector.load %arg3[%c0_2, %c0_3] : memref<16x128xf32, #tpu.memory_space<vmem>>, vector<16x128xf32>
    %5 = math.log %3 : vector<16x128xf32>
    %cst = arith.constant -1.000000e+02 : f32
    %6 = vector.broadcast %cst : f32 to vector<16x128xf32>
    %7 = arith.maximumf %5, %6 : vector<16x128xf32>
    %cst_4 = arith.constant 1.000000e+00 : f32
    %8 = vector.broadcast %cst_4 : f32 to vector<16x128xf32>
    %9 = arith.subf %8, %3 : vector<16x128xf32>
    %10 = math.log %9 : vector<16x128xf32>
    %cst_5 = arith.constant -1.000000e+02 : f32
    %11 = vector.broadcast %cst_5 : f32 to vector<16x128xf32>
    %12 = arith.maximumf %10, %11 : vector<16x128xf32>
    %13 = arith.mulf %4, %7 : vector<16x128xf32>
    %cst_6 = arith.constant 1.000000e+00 : f32
    %14 = vector.broadcast %cst_6 : f32 to vector<16x128xf32>
    %15 = arith.subf %14, %4 : vector<16x128xf32>
    %16 = arith.mulf %15, %12 : vector<16x128xf32>
    %17 = arith.addf %13, %16 : vector<16x128xf32>
    %cst_7 = arith.constant 0.000000e+00 : f32
    %18 = vector.broadcast %cst_7 : f32 to vector<16x128xf32>
    %19 = arith.subf %18, %17 : vector<16x128xf32>
    %cst_8 = arith.constant 0.000000e+00 : f32
    %20 = vector.broadcast %cst_8 : f32 to vector<16x128xf32>
    %21 = arith.subf %20, %19 : vector<16x128xf32>
    %22 = math.exp %21 : vector<16x128xf32>
    %cst_9 = arith.constant 1.000000e+00 : f32
    %23 = vector.broadcast %cst_9 : f32 to vector<16x128xf32>
    %24 = arith.subf %23, %22 : vector<16x128xf32>
    %25 = arith.mulf %24, %24 : vector<16x128xf32>
    %cst_10 = arith.constant 1.000000e+00 : f32
    %26 = vector.broadcast %cst_10 : f32 to vector<16x128xf32>
    %27 = arith.mulf %26, %25 : vector<16x128xf32>
    %28 = arith.mulf %27, %19 : vector<16x128xf32>
    %c1_i32 = arith.constant 1 : i32
    %29 = arith.muli %arg0, %c1_i32 : i32
    %30 = arith.addi %29, %arg1 : i32
    %31 = tpu.iota {dimensions = array<i32: 0>} : vector<16x128xi32>
    %32 = tpu.iota {dimensions = array<i32: 1>} : vector<16x128xi32>
    %c16_i32 = arith.constant 16 : i32
    %33 = arith.muli %30, %c16_i32 : i32
    %34 = vector.broadcast %33 : i32 to vector<16x128xi32>
    %35 = arith.addi %34, %31 : vector<16x128xi32>
    %c128_i32 = arith.constant 128 : i32
    %36 = vector.broadcast %c128_i32 : i32 to vector<16x128xi32>
    %37 = arith.muli %35, %36 : vector<16x128xi32>
    %38 = arith.addi %37, %32 : vector<16x128xi32>
    %c2048_i32 = arith.constant 2048 : i32
    %39 = vector.broadcast %c2048_i32 : i32 to vector<16x128xi32>
    %40 = arith.cmpi slt, %38, %39 : vector<16x128xi32>
    %cst_11 = arith.constant 0.000000e+00 : f32
    %41 = vector.broadcast %cst_11 : f32 to vector<16x128xf32>
    %42 = arith.select %40, %28, %41 : vector<16x128xi1>, vector<16x128xf32>
    %c0_12 = arith.constant 0 : index
    %c0_13 = arith.constant 0 : index
    %43 = vector.load %arg5[%c0_12, %c0_13] : memref<8x128xf32, #tpu.memory_space<vmem>>, vector<8x128xf32>
    %44 = vector.shape_cast %42 : vector<16x128xf32> to vector<2x8x128xf32>
    %cst_14 = arith.constant dense<0.000000e+00> : vector<8x128xf32>
    %45 = vector.multi_reduction <add>, %44, %cst_14 [0] : vector<2x8x128xf32> to vector<8x128xf32>
    %46 = arith.addf %43, %45 : vector<8x128xf32>
    %c0_15 = arith.constant 0 : index
    %c0_16 = arith.constant 0 : index
    %47 = vector.load %arg5[%c0_15, %c0_16] : memref<8x128xf32, #tpu.memory_space<vmem>>, vector<8x128xf32>
    tpu.vector_store %arg5[%c0_15, %c0_16], %46 {strides = array<i32>} : memref<8x128xf32, #tpu.memory_space<vmem>>, vector<8x128xf32>,
    %c0_i32_17 = arith.constant 0 : i32
    %48 = arith.cmpi eq, %arg1, %c0_i32_17 : i32
    %49 = arith.extui %48 : i1 to i32
    %c0_i32_18 = arith.constant 0 : i32
    %50 = arith.cmpi ne, %49, %c0_i32_18 : i32
    scf.if %50 {
      %c0_19 = arith.constant 0 : index
      %c0_20 = arith.constant 0 : index
      %51 = vector.load %arg5[%c0_19, %c0_20] : memref<8x128xf32, #tpu.memory_space<vmem>>, vector<8x128xf32>
      %c0_21 = arith.constant 0 : index
      %c0_22 = arith.constant 0 : index
      %52 = vector.load %arg4[%c0_21, %c0_22] : memref<8x128xf32, #tpu.memory_space<vmem>>, vector<8x128xf32>
      tpu.vector_store %arg4[%c0_21, %c0_22], %51 {strides = array<i32>} : memref<8x128xf32, #tpu.memory_space<vmem>>, vector<8x128xf32>,
    } else {
    }
    return
  }
  func.func @transform_0(%arg0: i32, %arg1: i32) -> (i32, i32) {
    %c1_i32 = arith.constant 1 : i32
    %0 = arith.muli %arg0, %c1_i32 : i32
    %1 = arith.addi %0, %arg1 : i32
    %c0_i32 = arith.constant 0 : i32
    %2 = arith.minsi %1, %c0_i32 : i32
    %c0_i32_0 = arith.constant 0 : i32
    %c0_i32_1 = arith.constant 0 : i32
    return %2, %c0_i32_0 : i32, i32
  }
  func.func @transform_1(%arg0: i32, %arg1: i32) -> (i32, i32) {
    %c1_i32 = arith.constant 1 : i32
    %0 = arith.muli %arg0, %c1_i32 : i32
    %1 = arith.addi %0, %arg1 : i32
    %c0_i32 = arith.constant 0 : i32
    %2 = arith.minsi %1, %c0_i32 : i32
    %c0_i32_0 = arith.constant 0 : i32
    %c0_i32_1 = arith.constant 0 : i32
    return %2, %c0_i32_0 : i32, i32
  }
  func.func @transform_2(%arg0: i32, %arg1: i32) -> (i32, i32) {
    %c0_i32 = arith.constant 0 : i32
    %c0_i32_0 = arith.constant 0 : i32
    return %arg0, %c0_i32 : i32, i32
  }
}

</mosaic_0001>

<bundles_post_ra>
// kernel: tpu_custom_call.1
= control target key start
LH: loop header
LB: loop body
LE: loop exit
PB: predicated region body
PF: predicated region fallthrough
CT: control target
= control target key end

     0   :  { %7 = vsyncpa [#allocation4], 0  ;;  %s916_s0 = inlined_call_operand.hbm [shape: f32[16,128], index: 0, kind: input, shape index: {}]   ;;  %s917_s1 = inlined_call_operand.hbm [shape: f32[16,128], index: 1, kind: input, shape index: {}]   ;;  %s918_s2 = inlined_call_operand.hbm [shape: f32[16,128], index: 2, kind: output, shape index: {}]  }
   0x1   :  { %9 = vsyncpa [#allocation4 + $0x1], 0 }
   0x2   :  { %10 = vsyncpa [#allocation7], 0 }
   0x3   :  { %12 = vsyncpa [#allocation7 + $0x1], 0 }
   0x4   :  { %13 = vsyncpa [#allocation5], 0 }
   0x5   :  { %15 = vsyncpa [#allocation5 + $0x1], 0  ;;  %s747_s9 = smov 0   ;;  %s749_s10 = smov 0  }
   0x6   :  { %s751_s11 = smov 0   ;;  %s753_s12 = smov 0  }
   0x7   :  { %s755_s13 = smov 0   ;;  %s757_s14 = smov 0  }
   0x8   :  { %s759_s15 = smov 0   ;;  %s761_s16 = smov 0  }
   0x9 LB: > { %s433_s17 = sadd.s32 4294967295, %s726_s16   ;;  %s434_s18 = sadd.s32 4294967294, %s726_s16   ;;  %s726_s16 = sphi %s761_s16, %s21_s16   ;;  %s722_s15 = sphi %s759_s15, %s930_s15   ;;  %s718_s14 = sphi %s757_s14, %s929_s14   ;;  %s714_s13 = sphi %s755_s13, %s906_s13   ;;  %s710_s12 = sphi %s753_s12, %s928_s12   ;;  %s706_s11 = sphi %s751_s11, %s927_s11   ;;  %s702_s10 = sphi %s749_s10, %s926_s10   ;;  %s698_s9 = sphi %s747_s9, %s925_s9  }
   0xa   : > { %s33_s19 = sadd.s32 1, %s722_s15  ;;  %p695_p1 = scmp.ne.s32.totalorder %s714_s13, 0 }
   0xb   : > { %p35_p0 = scmp.ge.s32.totalorder %s33_s19, 2  ;;  %p54_p2 = scmp.eq.s32.totalorder %s726_s16, 0 }
   0xc   : > { %p59_p3 = scmp.ne.s32.totalorder %s714_s13, %s710_s12  ;;  %p60_p5 = scmp.eq.s32.totalorder %s433_s17, 0 }
   0xd   : > { %s932_s19 = smov (%p35_p0, %s33_s19), 0  ;;  %p793_p4 = por %p695_p1, %p54_p2 }
   0xe   : > { %p797_p6 = por %p60_p5, %p59_p3  ;;  %s101_s22 = ssub.s32 %s722_s15, %s932_s19 }
   0xf   : > { %p102_p7 = scmp.eq.s32.totalorder %s101_s22, 0  ;;  %s104_s23 = sadd.s32 1, %s706_s11 }
  0x10   : > { %p114_p8 = scmp.ne.s32.totalorder %s706_s11, %s702_s10  ;;  %p115_p9 = scmp.eq.s32.totalorder %s433_s17, 1 }
  0x11   : > { %s805_s24 = scalar_select %p102_p7, %s706_s11, %s104_s23  }
  0x12   : > { %p120_p10 = scmp.ne.s32.totalorder %s702_s10, %s698_s9  ;;  %p121_p11 = scmp.eq.s32.totalorder %s434_s18, 1 }
  0x13   : > { %p811_p12 = por %p115_p9, %p114_p8  ;;  %p436_p13 = scmp.ge.s32.totalorder %s726_s16, 2 }
  0x14   : > { %p816_p0 = por %p121_p11, %p120_p10  ;;  %p471_p1 = scmp.lt.s32.totalorder %s726_s16, 2 }
  0x15   : > { %s154_s29 = sshll.u32 %s916_s0, 4  ;;  %s728_s30 = smov [#allocation3]   ;;  %s155_s29 = int_to_ptr.hbm [resolvable:$true] %s154_s29 }
  0x16   : > { %s156_s3 = sshll.u32 %s728_s30, 4  ;;  %p826_p2 = pnand %p471_p1, %p793_p4  ;;  %s157_s3 = int_to_ptr.vmem [resolvable:$true] %s156_s3 }
  0x17   : > { %p443_p3 = scmp.ge.s32.totalorder %s726_s16, 1  ;;  %p189_p5 = scmp.lt.s32.totalorder %s726_s16, 3 }
  0x18   : > { %s559_s5 = sshra.s32 %s155_s29, 4  ;;  %p563_p8 = pneg %p826_p2  ;;  %s560_s5 = int_to_ptr.hbm [resolvable:$true] %s559_s5 }
  0x19   : > { %s561_s6 = scalar_lea.hbm %s560_s5, 16  ;;  %s566_s12 = scalar_lea.hbm %s916_s0, 16 }
  0x1a   : > { %p562_p7 = scmp.ne.s32.totalorder %s560_s5, %s561_s6  ;;  %p568_p4 = scmp.lt.s32.totalorder %s566_s12, %s561_s6 }
  0x1c   : > { %p564_p9 = pnand %p563_p8, %p562_p7 }
  0x1e   : > { %p565_p10 = pneg %p564_p9 }
  0x20   : > { %p570_p11 = pnand %p568_p4, %p565_p10 }
  0x22   : > { %573 = shalt.err (!%p570_p11)
}
  0x23   : > { %s729_s17 = smov 128   ;;  %s730_s18 = smov 8  }
  0x24   : > { %463 = dma.hbm_to_vmem [thread:$0]  (!%p826_p2), %s155_s29, 256, %s157_s3, [#allocation4], %s729_s17, %s729_s17, %s730_s18  }
  0x25   : > { %p846_p1 = pnand %p443_p3, %p189_p5  ;;  %s179_s27 = sshll.u32 %s917_s1, 4  ;;  %s180_s27 = int_to_ptr.hbm [resolvable:$true] %s179_s27 }
  0x26   : > { %s731_s28 = smov [#allocation6]   ;;  %s589_s5 = sshra.s32 %s180_s27, 4  ;;  %s590_s5 = int_to_ptr.hbm [resolvable:$true] %s589_s5 }
  0x27   : > { %s181_s30 = sshll.u32 %s731_s28, 4  ;;  %s591_s6 = scalar_lea.hbm %s590_s5, 16  ;;  %s182_s30 = int_to_ptr.vmem [resolvable:$true] %s181_s30 }
  0x28   : > { %p592_p7 = scmp.ne.s32.totalorder %s590_s5, %s591_s6  ;;  %s596_s7 = scalar_lea.hbm %s917_s1, 16 }
  0x29   : > { %p598_p3 = scmp.lt.s32.totalorder %s596_s7, %s591_s6 }
  0x2a   : > { %p594_p9 = pnand %p592_p7, %p563_p8 }
  0x2c   : > { %p595_p10 = pneg %p594_p9 }
  0x2e   : > { %p600_p5 = pnand %p598_p3, %p595_p10 }
  0x30   : > { %603 = shalt.err (!%p600_p5)
}
  0x31   : > { %466 = dma.hbm_to_vmem [thread:$0]  (!%p826_p2), %s180_s27, 256, %s182_s30, [#allocation7], %s729_s17, %s729_s17, %s730_s18  }
  0x32   : > { %193 = sbr.rel (%p846_p1) target bundleno = 102 (0x66), region = 28  ;;  %s195_s8 = sand.u32 (!%p846_p1), 1, %s714_s13  }
  0x33   : > { %s444_s12 = sshll.u32 (!%p846_p1), %s195_s8, 4  ;;  %s196_s22 = scalar_lea.sflag (!%p846_p1), [#allocation4], %s195_s8 }
  0x34   : > { %s199_s23 = scalar_lea.vmem (!%p846_p1), [#allocation3], %s444_s12 }
  0x37   : > { %684 = dma.done.wait (%p797_p6), %s196_s22, 256  }
  0x38   : > { %686 = vsyncadd (%p797_p6), %s196_s22, 4294967040  ;;  %s206_s28 = scalar_lea.sflag [#allocation7], %s195_s8  ;;  %s209_s5 = scalar_lea.vmem [#allocation6], %s444_s12 }
  0x39   : > { %688 = dma.done.wait (%p797_p6), %s206_s28, 256  }
  0x3a   : > { %690 = vsyncadd (%p797_p6), %s206_s28, 4294967040  ;;  %v249_v0 = vld [vmem:[%s199_s23] sm:$0xff]  ;;  %v250_v1 = vld [vmem:[%s199_s23 + $0x8] sm:$0xff]  ;;  %v290_v18 = vlaneseq  ;;  %s447_s21 = sshll.u32 %s718_s14, 4  ;;  %s233_s4 = sand.u32 1, %s702_s10  }
  0x3b   : > { %547 = vlog2.f32 %v249_v0  ;;  %v259_v2 = vsub.f32 1.0, %v249_v0  ;;  %v260_v3 = vsub.f32 1.0, %v250_v1  ;;  %v251_v5 = vld [vmem:[%s209_s5] sm:$0xff]  ;;  %v252_v7 = vld [vmem:[%s209_s5 + $0x8] sm:$0xff]  ;;  %v296_v31 = vstv %s447_s21  ;;  %s446_s17 = sshll.u32 %s233_s4, 3  ;;  %s449_s18 = sshll.u32 %s718_s14, 3 }
  0x3c   : > { %549 = vlog2.f32 %v250_v1  ;;  %v269_v14 = vsub.f32 1.0, %v251_v5  ;;  %v270_v17 = vsub.f32 1.0, %v252_v7  ;;  %v291_v25 = vshrl.u32 %v290_v18, 7  ;;  %s327_s30 = scalar_lea.hbm %s918_s2, %s449_s18  ;;  %s235_s6 = scalar_lea.vmem [#allocation8], %s446_s17 }
  0x3d   : > { %551 = vlog2.f32 %v259_v2  ;;  %v294_v38 = vand.u32 127, %v290_v18  ;;  %s329_s29 = sshll.u32 %s235_s6, 4  ;;  %s331_s3 = sshll.u32 %s327_s30, 4  ;;  %s330_s29 = int_to_ptr.vmem [resolvable:$true] %s329_s29  ;;  %s332_s3 = int_to_ptr.hbm [resolvable:$true] %s331_s3 }
  0x3e   : > { %553 = vlog2.f32 %v260_v3  ;;  %v292_v30 = vadd.s32 8, %v291_v25  ;;  %v297_v35 = vadd.s32 %v296_v31, %v291_v25  ;;  %s317_s14 = scalar_lea.sflag [#allocation5], %s233_s4  ;;  %s633_s7 = sshra.s32 %s332_s3, 4  ;;  %s634_s7 = int_to_ptr.hbm [resolvable:$true] %s633_s7 }
  0x3f   : > { %s635_s8 = scalar_lea.hbm %s634_s7, 8  ;;  %s639_s23 = scalar_lea.hbm %s918_s2, 16 }
  0x40   : > { %v298_v37 = vadd.s32 %v296_v31, %v292_v30  ;;  %v299_v39 = vmul.u32 128, %v297_v35  ;;  %p636_p6 = scmp.ne.s32.totalorder %s634_s7, %s635_s8  ;;  %p640_p4 = scmp.lt.s32.totalorder %s634_s7, %s918_s2 }
  0x41   : > { %v548_v4 = vpop.eup %547  ;;  %p641_p11 = scmp.lt.s32.totalorder %s639_s23, %s635_s8 }
  0x42   : > { %v550_v6 = vpop.eup %549  ;;  %v254_v8 = vmul.f32 0.6931472, %v548_v4  ;;  %v300_v40 = vmul.u32 128, %v298_v37  ;;  %v301_v42 = vadd.s32 %v299_v39, %v294_v38  ;;  %p637_p2 = pnand %p636_p6, %p811_p12 }
  0x43   : > { %v552_v9 = vpop.eup %551  ;;  %v256_v10 = vmul.f32 0.6931472, %v550_v6  ;;  %p642_p1 = por %p641_p11, %p640_p4 }
  0x44   : > { %v554_v11 = vpop.eup %553  ;;  %v257_v12 = vmax.f32 %v254_v8, -100.0  ;;  %v262_v13 = vmul.f32 0.6931472, %v552_v9  ;;  %v302_v45 = vadd.s32 %v300_v40, %v294_v38  ;;  %vm303_vm0 = vcmp.lt.s32.totalorder %v301_v42, 2048  ;;  %p638_p8 = pneg %p637_p2 }
  0x45   : > { %v258_v15 = vmax.f32 %v256_v10, -100.0  ;;  %v264_v16 = vmul.f32 0.6931472, %v554_v11 }
  0x46   : > { %v265_v19 = vmax.f32 %v262_v13, -100.0  ;;  %v267_v20 = vmul.f32 %v257_v12, %v251_v5  ;;  %vm304_vm1 = vcmp.lt.s32.totalorder %v302_v45, 2048  ;;  %p643_p7 = pnand %p642_p1, %p638_p8 }
  0x47   : > { %v266_v21 = vmax.f32 %v264_v16, -100.0  ;;  %v268_v22 = vmul.f32 %v258_v15, %v252_v7 }
  0x48   : > { %v271_v23 = vmul.f32 %v269_v14, %v265_v19 }
  0x49   : > { %v272_v24 = vmul.f32 %v270_v17, %v266_v21 }
  0x4a   : > { %v273_v26 = vadd.f32 %v271_v23, %v267_v20 }
  0x4b   : > { %v274_v27 = vadd.f32 %v272_v24, %v268_v22 }
  0x4c   : > { %v275_v28 = vsub.f32 0.0, %v273_v26 }
  0x4d   : > { %v276_v29 = vsub.f32 0.0, %v274_v27 }
  0x4e   : > { %v277_v32 = vsub.f32 0.0, %v275_v28 }
  0x4f   : > { %v278_v33 = vsub.f32 0.0, %v276_v29 }
  0x50   : > { %v279_v34 = vmul.f32 1.442695, %v277_v32 }
  0x51   : > { %v281_v36 = vmul.f32 1.442695, %v278_v33 }
  0x52   : > { %555 = vpow2.f32 %v279_v34 }
  0x53   : > { %557 = vpow2.f32 %v281_v36 }
  0x58   : > { %v556_v41 = vpop.eup %555 }
  0x59   : > { %v558_v43 = vpop.eup %557  ;;  %v283_v44 = vsub.f32 1.0, %v556_v41 }
  0x5a   : > { %v284_v46 = vsub.f32 1.0, %v558_v43 }
  0x5b   : > { %v285_v47 = vmul.f32 %v283_v44, %v283_v44 }
  0x5c   : > { %v286_v48 = vmul.f32 %v284_v46, %v284_v46 }
  0x5d   : > { %v287_v49 = vmul.f32 %v285_v47, %v275_v28 }
  0x5e   : > { %v288_v50 = vmul.f32 %v286_v48, %v276_v29 }
  0x5f   : > { %v305_v51 = vsel %vm303_vm0, %v287_v49, 0.0 }
  0x60   : > { %v306_v52 = vsel %vm304_vm1, %v288_v50, 0.0 }
  0x61   : > { %v308_v53 = vadd.f32 %v306_v52, %v305_v51 }
  0x63   : > { %315 = vst [vmem:[%s235_s6] sm:$0xff] %v308_v53 }
  0x64   : > { %646 = shalt.err (!%p643_p7)
}
  0x65   : > { %458 = dma.vmem_to_hbm [thread:$0]  (%p811_p12), %s330_s29, 128, %s332_s3, %s317_s14  }
  0x66 PF: > { %s343_s21 = sand.u32 1, %s698_s9   ;;  %p468_p9 = pnand %p436_p13, %p816_p0 }
  0x67   : > { %s344_s4 = scalar_lea.sflag [#allocation5], %s343_s21 }
  0x68   : > { %p469_p10 = pneg %p468_p9 }
  0x6a   : > { %692 = dma.done.wait (%p469_p10), %s344_s4, 128  }
  0x6b   : > { %694 = vsyncadd (%p469_p10), %s344_s4, 4294967168  ;;  %s21_s16 = sadd.s32 1, %s726_s16   ;;  %s925_s9 = smov %s702_s10 }
  0x6c   : > { %p18_p3 = scmp.ge.s32.totalorder %s21_s16, 4   ;;  %s926_s10 = smov %s706_s11 }
  0x6d   : > { %s927_s11 = smov %s805_s24  ;;  %s928_s12 = smov %s714_s13 }
  0x6e   : > { %s906_s13 = smov 0   ;;  %s929_s14 = smov %s722_s15 }
  0x6f   : > { %s930_s15 = smov %s932_s19  ;;  %20 = sbr.rel (!%p18_p3) target bundleno = 9 (0x9), region = 94 }
  0x74   :  { %350 = vsyncpa [#allocation4], 1 }
  0x75   :  { %352 = vsyncpa [#allocation4 + $0x1], 1 }
  0x76   :  { %353 = vsyncpa [#allocation7], 1 }
  0x77   :  { %355 = vsyncpa [#allocation7 + $0x1], 1 }
  0x78   :  { %356 = vsyncpa [#allocation5], 1 }
  0x79   :  { %358 = vsyncpa [#allocation5 + $0x1], 1 }

</bundles_post_ra>
